<compile_context>
chip_gen: v7x
topology: tpu7x:2x2x1
jax: 0.10.0
libtpu: 0.0.40
codegen_flags: <defaults>
</compile_context>

<pallas_src>
import jax
import jax.numpy as jnp
from jax.experimental import pallas as pl
from jax.experimental.pallas import tpu as pltpu


def _se_kernel(x_ref, w1t_ref, b1_ref, w2t_ref, b2_ref, o_ref):
    # x_ref:  (1, C, HW)  native dtype          o_ref: (1, C, HW)
    # w1t_ref: (C, HID)   (pre-transposed W1)   b1_ref: (1, HID)
    # w2t_ref: (HID, C)   (pre-transposed W2)   b2_ref: (1, C)
    x = x_ref[...]                                                   # (1, C, HW)

    # AdaptiveAvgPool2d(1): mean over the spatial (lane) axis.
    # Only the tiny pooled vector is promoted to f32 for the FC path.
    pooled = jnp.mean(x, axis=-1).astype(jnp.float32)                # (1, C)

    # Linear 1 (PyTorch convention y = z @ W1.T + b1; W1.T passed in) + ReLU
    z1 = jnp.dot(pooled, w1t_ref[...],
                 preferred_element_type=jnp.float32) + b1_ref[...]   # (1, HID)
    z1 = jnp.maximum(z1, 0.0)

    # Linear 2
    z2 = jnp.dot(z1, w2t_ref[...],
                 preferred_element_type=jnp.float32) + b2_ref[...]   # (1, C)

    # Hardsigmoid: clip((x + 3) / 6, 0, 1)  -- multiply by const 1/6, no divide
    scale = jnp.clip((z2 + 3.0) * (1.0 / 6.0), 0.0, 1.0)             # (1, C)

    # Broadcast multiply over the spatial axis, in x's native dtype.
    o_ref[...] = (x * scale[:, :, None].astype(x.dtype)).astype(o_ref.dtype)


def se_block(x, w1, b1, w2, b2):
    """x: (B, C, H, W); w1: (HID, C); b1: (HID,); w2: (C, HID); b2: (C,)."""
    B, C, H, W = x.shape
    HID = w1.shape[0]
    HW = H * W

    x3 = x.reshape(B, C, HW)
    w1t = jnp.transpose(w1)          # (C, HID)  -- transpose once, outside kernel
    w2t = jnp.transpose(w2)          # (HID, C)
    b1_2d = b1.reshape(1, HID)
    b2_2d = b2.reshape(1, C)

    itemsize = jnp.dtype(x.dtype).itemsize
    cost = pl.CostEstimate(
        flops=2 * B * C * HID * 2 + B * C * HW * 2,   # two tiny FCs + pool/scale
        transcendentals=0,
        bytes_accessed=2 * B * C * HW * itemsize,      # read x + write out
    )

    # Note: when the caller can donate x, input_output_aliases={0: 0} avoids a
    # second full-size HBM activation buffer; omitted here since x is reused.
    out3 = pl.pallas_call(
        _se_kernel,
        out_shape=jax.ShapeDtypeStruct((B, C, HW), x.dtype),
        grid=(B,),
        in_specs=[
            pl.BlockSpec((1, C, HW), lambda b: (b, 0, 0)),
            pl.BlockSpec((C, HID), lambda b: (0, 0)),
            pl.BlockSpec((1, HID), lambda b: (0, 0)),
            pl.BlockSpec((HID, C), lambda b: (0, 0)),
            pl.BlockSpec((1, C), lambda b: (0, 0)),
        ],
        out_specs=pl.BlockSpec((1, C, HW), lambda b: (b, 0, 0)),
        compiler_params=pltpu.CompilerParams(
            dimension_semantics=("parallel",)),
        cost_estimate=cost,
    )(x3, w1t, b1_2d, w2t, b2_2d)

    return out3.reshape(B, C, H, W)


def _reference(x, w1, b1, w2, b2):
    pooled = jnp.mean(x, axis=(2, 3))
    z = jnp.maximum(pooled @ w1.T + b1, 0.0)
    z = z @ w2.T + b2
    s = jnp.clip((z + 3.0) / 6.0, 0.0, 1.0)
    return x * s[:, :, None, None]


if __name__ == "__main__":
    B, C, H, W = 2, 8, 16, 16
    RATIO = 4
    HID = C // RATIO

    key = jax.random.PRNGKey(0)
    kx, kw1, kb1, kw2, kb2 = jax.random.split(key, 5)

    x = jax.random.normal(kx, (B, C, H, W), dtype=jnp.float32)
    # deterministic synthetic parameters (shapes follow nn.Linear(in, out))
    w1 = jax.random.normal(kw1, (HID, C), dtype=jnp.float32) * 0.1
    b1 = jax.random.normal(kb1, (HID,), dtype=jnp.float32) * 0.1
    w2 = jax.random.normal(kw2, (C, HID), dtype=jnp.float32) * 0.1
    b2 = jax.random.normal(kb2, (C,), dtype=jnp.float32) * 0.1

    out = se_block(x, w1, b1, w2, b2)
    out = jax.block_until_ready(out)

    ref = _reference(x, w1, b1, w2, b2)
    assert out.shape == (B, C, H, W)
    assert jnp.allclose(out, ref, atol=1e-5, rtol=1e-5), "mismatch vs reference"

    print("KERNEL_OK")
</pallas_src>

<mosaic_0001>
module attributes {stable_mosaic.version = 11 : i64} {
  func.func @_se_kernel(%arg0: i32, %arg1: memref<1x8x256xf32, #tpu.memory_space<vmem>>, %arg2: memref<8x2xf32, #tpu.memory_space<vmem>>, %arg3: memref<1x2xf32, #tpu.memory_space<vmem>>, %arg4: memref<2x8xf32, #tpu.memory_space<vmem>>, %arg5: memref<1x8xf32, #tpu.memory_space<vmem>>, %arg6: memref<1x8x256xf32, #tpu.memory_space<vmem>>) attributes {dimension_semantics = [#tpu.dimension_semantics<parallel>], iteration_bounds = array<i64: 2>, scalar_prefetch = 0 : i64, scratch_operands = 0 : i64, tpu.core_type = #tpu.core_type<tc>, window_params = [{transform_indices = @transform_0, window_bounds = array<i64: 1, 8, 256>}, {pipeline_mode = #tpu.pipeline_mode<synchronous>, transform_indices = @transform_1, window_bounds = array<i64: 8, 2>}, {pipeline_mode = #tpu.pipeline_mode<synchronous>, transform_indices = @transform_2, window_bounds = array<i64: 1, 2>}, {pipeline_mode = #tpu.pipeline_mode<synchronous>, transform_indices = @transform_3, window_bounds = array<i64: 2, 8>}, {pipeline_mode = #tpu.pipeline_mode<synchronous>, transform_indices = @transform_4, window_bounds = array<i64: 1, 8>}, {transform_indices = @transform_5, window_bounds = array<i64: 1, 8, 256>}]} {
    %c0 = arith.constant 0 : index
    %c0_0 = arith.constant 0 : index
    %c0_1 = arith.constant 0 : index
    %0 = vector.load %arg1[%c0, %c0_0, %c0_1] : memref<1x8x256xf32, #tpu.memory_space<vmem>>, vector<1x8x256xf32>
    %cst = arith.constant dense<0.000000e+00> : vector<1x8xf32>
    %1 = vector.multi_reduction <add>, %0, %cst [2] : vector<1x8x256xf32> to vector<1x8xf32>
    %cst_2 = arith.constant 2.560000e+02 : f32
    %2 = vector.broadcast %cst_2 : f32 to vector<1x8xf32>
    %3 = arith.divf %1, %2 : vector<1x8xf32>
    %c0_3 = arith.constant 0 : index
    %c0_4 = arith.constant 0 : index
    %4 = vector.load %arg2[%c0_3, %c0_4] : memref<8x2xf32, #tpu.memory_space<vmem>>, vector<8x2xf32>
    %cst_5 = arith.constant dense<0.000000e+00> : vector<1x2xf32>
    %5 = tpu.matmul %3, %4, %cst_5 {dimension_numbers = #tpu.dot_dimension_numbers<[1], [0], [0], [1], [0, 0, 1, 1], [], []>} : vector<1x8xf32>, vector<8x2xf32>, vector<1x2xf32> -> vector<1x2xf32>
    %c0_6 = arith.constant 0 : index
    %c0_7 = arith.constant 0 : index
    %6 = vector.load %arg3[%c0_6, %c0_7] : memref<1x2xf32, #tpu.memory_space<vmem>>, vector<1x2xf32>
    %7 = arith.addf %5, %6 : vector<1x2xf32>
    %cst_8 = arith.constant 0.000000e+00 : f32
    %8 = vector.broadcast %cst_8 : f32 to vector<1x2xf32>
    %9 = arith.maximumf %7, %8 : vector<1x2xf32>
    %c0_9 = arith.constant 0 : index
    %c0_10 = arith.constant 0 : index
    %10 = vector.load %arg4[%c0_9, %c0_10] : memref<2x8xf32, #tpu.memory_space<vmem>>, vector<2x8xf32>
    %cst_11 = arith.constant dense<0.000000e+00> : vector<1x8xf32>
    %11 = tpu.matmul %9, %10, %cst_11 {dimension_numbers = #tpu.dot_dimension_numbers<[1], [0], [0], [1], [0, 0, 1, 1], [], []>} : vector<1x2xf32>, vector<2x8xf32>, vector<1x8xf32> -> vector<1x8xf32>
    %c0_12 = arith.constant 0 : index
    %c0_13 = arith.constant 0 : index
    %12 = vector.load %arg5[%c0_12, %c0_13] : memref<1x8xf32, #tpu.memory_space<vmem>>, vector<1x8xf32>
    %13 = arith.addf %11, %12 : vector<1x8xf32>
    %cst_14 = arith.constant 3.000000e+00 : f32
    %14 = vector.broadcast %cst_14 : f32 to vector<1x8xf32>
    %15 = arith.addf %13, %14 : vector<1x8xf32>
    %cst_15 = arith.constant 0.166666672 : f32
    %16 = vector.broadcast %cst_15 : f32 to vector<1x8xf32>
    %17 = arith.mulf %15, %16 : vector<1x8xf32>
    %cst_16 = arith.constant 0.000000e+00 : f32
    %cst_17 = arith.constant 1.000000e+00 : f32
    %18 = vector.broadcast %cst_16 : f32 to vector<1x8xf32>
    %19 = arith.maximumf %18, %17 : vector<1x8xf32>
    %20 = vector.broadcast %cst_17 : f32 to vector<1x8xf32>
    %21 = arith.minimumf %20, %19 : vector<1x8xf32>
    %22 = vector.shape_cast %21 : vector<1x8xf32> to vector<1x8x1xf32>
    %23 = vector.broadcast %22 : vector<1x8x1xf32> to vector<1x8x256xf32>
    %24 = arith.mulf %0, %23 : vector<1x8x256xf32>
    %c0_18 = arith.constant 0 : index
    %c0_19 = arith.constant 0 : index
    %c0_20 = arith.constant 0 : index
    %25 = vector.load %arg6[%c0_18, %c0_19, %c0_20] : memref<1x8x256xf32, #tpu.memory_space<vmem>>, vector<1x8x256xf32>
    tpu.vector_store %arg6[%c0_18, %c0_19, %c0_20], %24 {strides = array<i32>} : memref<1x8x256xf32, #tpu.memory_space<vmem>>, vector<1x8x256xf32>,
    return
  }
  func.func @transform_0(%arg0: i32) -> (i32, i32, i32) {
    %c0_i32 = arith.constant 0 : i32
    %c0_i32_0 = arith.constant 0 : i32
    %c0_i32_1 = arith.constant 0 : i32
    return %arg0, %c0_i32, %c0_i32_0 : i32, i32, i32
  }
  func.func @transform_1(%arg0: i32) -> (i32, i32) {
    %c0_i32 = arith.constant 0 : i32
    %c0_i32_0 = arith.constant 0 : i32
    %c0_i32_1 = arith.constant 0 : i32
    return %c0_i32, %c0_i32_0 : i32, i32
  }
  func.func @transform_2(%arg0: i32) -> (i32, i32) {
    %c0_i32 = arith.constant 0 : i32
    %c0_i32_0 = arith.constant 0 : i32
    %c0_i32_1 = arith.constant 0 : i32
    return %c0_i32, %c0_i32_0 : i32, i32
  }
  func.func @transform_3(%arg0: i32) -> (i32, i32) {
    %c0_i32 = arith.constant 0 : i32
    %c0_i32_0 = arith.constant 0 : i32
    %c0_i32_1 = arith.constant 0 : i32
    return %c0_i32, %c0_i32_0 : i32, i32
  }
  func.func @transform_4(%arg0: i32) -> (i32, i32) {
    %c0_i32 = arith.constant 0 : i32
    %c0_i32_0 = arith.constant 0 : i32
    %c0_i32_1 = arith.constant 0 : i32
    return %c0_i32, %c0_i32_0 : i32, i32
  }
  func.func @transform_5(%arg0: i32) -> (i32, i32, i32) {
    %c0_i32 = arith.constant 0 : i32
    %c0_i32_0 = arith.constant 0 : i32
    %c0_i32_1 = arith.constant 0 : i32
    return %arg0, %c0_i32, %c0_i32_0 : i32, i32, i32
  }
}

</mosaic_0001>

<bundles_post_ra>
// kernel: tpu_custom_call.1
= control target key start
LH: loop header
LB: loop body
LE: loop exit
PB: predicated region body
PF: predicated region fallthrough
CT: control target
= control target key end

     0   :  { %10 = vsyncpa [#allocation3], 0  ;;  %s901_s0 = inlined_call_operand.hbm [shape: f32[2,8,256], index: 0, kind: input, shape index: {}]   ;;  %s902_s1 = inlined_call_operand.vmem [shape: f32[8,2], index: 1, kind: input, shape index: {}]   ;;  %s903_s2 = inlined_call_operand.vmem [shape: f32[1,2], index: 2, kind: input, shape index: {}]   ;;  %s904_s3 = inlined_call_operand.vmem [shape: f32[2,8], index: 3, kind: input, shape index: {}]   ;;  %s905_s4 = inlined_call_operand.vmem [shape: f32[1,8], index: 4, kind: input, shape index: {}]   ;;  %s906_s5 = inlined_call_operand.hbm [shape: f32[2,8,256], index: 5, kind: output, shape index: {}]  }
   0x1   :  { %12 = vsyncpa [#allocation3 + $0x1], 0 }
   0x2   :  { %13 = vsyncpa [#allocation4], 0 }
   0x3   :  { %15 = vsyncpa [#allocation4 + $0x1], 0  ;;  %s724_s18 = smov 0   ;;  %s726_s19 = smov 0  }
   0x4   :  { %s728_s20 = smov 0   ;;  %s730_s21 = smov 0  }
   0x5 LB: > { %s745_s22 = sadd.s32 4294967295, %s688_s21   ;;  %s511_s23 = sadd.s32 4294967294, %s688_s21   ;;  %s688_s21 = sphi %s730_s21, %s921_s21   ;;  %s684_s20 = sphi %s728_s20, %s920_s20   ;;  %s680_s19 = sphi %s726_s19, %s919_s19   ;;  %s676_s18 = sphi %s724_s18, %s918_s18  }
   0x6   : > { %s749_s24 = sadd.s32 1, %s688_s21   ;;  %s28_s25 = sadd.s32 1, %s684_s20 }
   0x7   : > { %s25_s26 = ssub.s32 %s688_s21, %s749_s24  ;;  %p35_p0 = scmp.ne.s32.totalorder %s684_s20, %s680_s19 }
   0x8   : > { %p26_p1 = scmp.eq.s32.totalorder %s25_s26, 0  ;;  %p36_p2 = scmp.eq.s32.totalorder %s688_s21, 0 }
   0x9   : > { %p41_p3 = scmp.ne.s32.totalorder %s680_s19, %s676_s18  ;;  %p42_p4 = scmp.eq.s32.totalorder %s745_s22, 0 }
   0xa   : > { %s761_s27 = scalar_select %p26_p1, %s684_s20, %s28_s25  }
   0xb   : > { %p763_p5 = por %p36_p2, %p35_p0  ;;  %p767_p6 = por %p42_p4, %p41_p3 }
   0xc   : > { %p149_p7 = scmp.eq.s32.totalorder %s745_s22, 1  ;;  %p155_p8 = scmp.eq.s32.totalorder %s511_s23, 1 }
   0xd   : > { %p556_p10 = scmp.lt.s32.totalorder %s688_s21, 2  ;;  %s187_s7 = sand.u32 1, %s684_s20  }
   0xe   : > { %p774_p11 = por %p149_p7, %p35_p0  ;;  %p778_p12 = por %p155_p8, %p41_p3 }
   0xf   : > { %s528_s8 = sshll.u32 %s688_s21, 8  ;;  %s514_s9 = sshll.u32 %s187_s7, 4 }
  0x10   : > { %s910_s30 = scalar_select %p774_p11, 1, 0 }
  0x11   : > { %s911_s6 = scalar_select %p778_p12, 1, 0 }
  0x12   : > { %s787_s12 = scalar_lea.hbm %s901_s0, %s528_s8  ;;  %s191_s13 = scalar_lea.vmem [#allocation2], %s514_s9 }
  0x13   : > { %s199_s14 = sshll.u32 %s191_s13, 4  ;;  %p791_p13 = pnand %p556_p10, %p763_p5  ;;  %s795_s14 = int_to_ptr.vmem [resolvable:$true] %s199_s14 }
  0x14   : > { %s188_s16 = scalar_lea.sflag [#allocation3], %s187_s7  ;;  %s592_s17 = scalar_lea.hbm %s787_s12, 256 }
  0x15   : > { %p593_p2 = scmp.ne.s32.totalorder %s787_s12, %s592_s17  ;;  %p594_p3 = pneg %p791_p13 }
  0x16   : > { %s597_s26 = scalar_lea.hbm %s901_s0, 512  ;;  %p598_p5 = scmp.lt.u32.totalorder %s787_s12, %s901_s0 }
  0x17   : > { %p595_p4 = pnand %p594_p3, %p593_p2  ;;  %p599_p8 = scmp.lt.u32.totalorder %s597_s26, %s592_s17 }
  0x18   : > { %p601_p9 = scmp.lt.u32.totalorder %s592_s17, %s787_s12 }
  0x19   : > { %p596_p7 = pneg %p595_p4  ;;  %p600_p10 = por %p599_p8, %p598_p5 }
  0x1b   : > { %p602_p0 = por %p601_p9, %p600_p10 }
  0x1d   : > { %p603_p1 = pnand %p602_p0, %p596_p7 }
  0x1f   : > { %606 = shalt.err (!%p603_p1)
}
  0x20   : > { %s607_s7 = scalar_lea.vmem %s795_s14, 256  ;;  %s690_s9 = smov [#allocation2]  }
  0x21   : > { %p608_p2 = scmp.ne.s32.totalorder %s795_s14, %s607_s7  ;;  %s612_s10 = sshll.u32 %s690_s9, 4  ;;  %s613_s10 = int_to_ptr.vmem [resolvable:$false] %s612_s10 }
  0x22   : > { %s614_s11 = scalar_lea.vmem %s613_s10, 512  ;;  %p615_p11 = scmp.lt.s32.totalorder %s795_s14, %s613_s10 }
  0x23   : > { %p610_p4 = pnand %p608_p2, %p594_p3  ;;  %p616_p5 = scmp.lt.s32.totalorder %s614_s11, %s607_s7 }
  0x25   : > { %p611_p12 = pneg %p610_p4  ;;  %p617_p8 = por %p616_p5, %p615_p11 }
  0x27   : > { %p618_p9 = pnand %p617_p8, %p611_p12 }
  0x29   : > { %621 = shalt.err (!%p618_p9)
}
  0x2a   : > { %551 = dma.hbm_to_vmem [thread:$0]  (!%p791_p13), %s787_s12, 256, %s795_s14, %s188_s16  }
  0x2b   : > { %p913_p0 = scmp.lt.s32.totalorder %s688_s21, 3  ;;  %p914_p1 = scmp.ge.s32.totalorder %s688_s21, 1 }
  0x2d   : > { %p205_p3 = pnand %p914_p1, %p913_p0 }
  0x2e   : > { %s829_s13 = sand.u32 (!%p205_p3), 1, %s680_s19  }
  0x2f   : > { %208 = sbr.rel (%p205_p3) target bundleno = 775 (0x307), region = 40  ;;  %s518_s17 = sshll.u32 (!%p205_p3), %s829_s13, 4 }
  0x30   : > { %s211_s23 = scalar_lea.sflag (!%p205_p3), [#allocation3], %s829_s13  ;;  %s214_s15 = scalar_lea.vmem (!%p205_p3), [#allocation2], %s518_s17 }
  0x36   : > { %667 = dma.done.wait (%p767_p6), %s211_s23, 256  }
  0x37   : > { %669 = vsyncadd (%p767_p6), %s211_s23, 4294967040  ;;  %v241_v0 = vld [vmem:[%s214_s15] sm:$0xff]  ;;  %v242_v1 = vld [vmem:[%s214_s15 + $0x8] sm:$0xff]  ;;  %v691_v3 = vmov 0.0   ;;  %vm692_vm0 = vmmov 0   ;;  %v251_v5 = vlaneseq  ;;  %vm257_vm1 = vcmask 64512  }
  0x38   : > { %v243_v2 = vadd.f32 %v242_v1, %v241_v0  ;;  %534 = vmatprep.subr.mxu0 %v691_v3  ;;  %v248_v4 = vld [vmem:[%s902_s1] sm:$0xff]  ;;  %539 = vmatprep.subr.mxu1 %v691_v3  ;;  %vm337_vm2 = vcmask 1041408   ;;  %vm333_vm3 = vcmask 15360   ;;  %s529_s7 = sshll.u32 %s745_s22, 8  ;;  %s240_s9 = scalar_lea.vmem [#allocation5], %s518_s17 }
  0x39   : > { %535 = vmatpush3.msra.mxu0 %v248_v4  ;;  %536 = vmatprep.mubr.msk.f32.mxu0 %vm692_vm0, %v691_v3  ;;  %v252_v6 = vand.u32 127, %v251_v5  ;;  %v254_v7 = vshrl.u32 %v251_v5, 7  ;;  %v331_v12 = vld [vmem:[%s904_s3] sm:$0x3]  ;;  %s441_s10 = sshll.u32 %s240_s9, 4  ;;  %s857_s15 = scalar_lea.hbm %s906_s5, %s529_s7  ;;  %s859_s10 = int_to_ptr.vmem [resolvable:$true] %s441_s10 }
  0x3a   : > { %244 = vadd.xlane.f32.xlu0 %v243_v2  ;;  %541 = vmatprep.mubr.msk.f32.mxu1 %vm692_vm0, %v691_v3  ;;  %v249_v13 = vld [vmem:[%s903_s2] sm:$0x1]  ;;  %s427_s12 = scalar_lea.sflag [#allocation4], %s829_s13  ;;  %s622_s22 = scalar_lea.vmem %s859_s10, 256 }
  0x3b   : > { %v255_v8 = vsub.s32 %v252_v6, %v254_v7  ;;  %540 = vmatpush3.msk.msra.mxu1 %vm337_vm2, %v331_v12  ;;  %v332_v18 = vld [vmem:[%s905_s4] sm:$0x1]  ;;  %v417_v25 = vsub.s32 0, %v254_v7  ;;  %p623_p6 = scmp.ne.s32.totalorder %s859_s10, %s622_s22  ;;  %p915_p11 = scmp.ne.s32.totalorder %s910_s30, 0 }
  0x3c   : > { %s693_s17 = smov [#allocation5]  }
  0x3d   : > { %p624_p12 = pnand %p623_p6, %p915_p11  ;;  %s626_s14 = sshll.u32 %s693_s17, 4  ;;  %s627_s14 = int_to_ptr.vmem [resolvable:$false] %s626_s14 }
  0x3e   : > { %s628_s29 = scalar_lea.vmem %s627_s14, 512  ;;  %p629_p7 = scmp.lt.s32.totalorder %s859_s10, %s627_s14 }
  0x3f   : > { %p625_p13 = pneg %p624_p12  ;;  %p630_p10 = scmp.lt.s32.totalorder %s628_s29, %s622_s22 }
  0x41   : > { %p631_p2 = por %p630_p10, %p629_p7 }
  0x43   : > { %p632_p4 = pnand %p631_p2, %p625_p13 }
  0xc7   : > { %v245_v9 = vpop.xlane.xlu0 %244 }
  0xc8   : > { %v247_v10 = vmul.f32 0.00390625, %v245_v9 }
  0xca   : > { %v256_v11 = vrot.slane %v247_v10, %v255_v8 }
  0xcc   : > { %537 = vmatmul.mubr.msk.f32.vlgmr.msra.gmra.mrb[0].mxu0 %vm257_vm1, %v256_v11 }
 0x19f   : > { %v326_v14 = vpop.f32.mrb[0].mxu0 }
 0x1a0   : > { %v327_v15 = vadd.f32 %v326_v14, %v249_v13  ;;  %v538_v16 = vpop.f32.mrb[1].mxu0 }
 0x1a2   : > { %v330_v17 = vmax.f32 %v327_v15, 0.0 }
 0x1a4   : > { %542 = vmatmul.mubr.msk.f32.vlgmr.msra.gmra.mrb[0].mxu1 %vm333_vm3, %v330_v17 }
 0x277   : > { %v407_v19 = vpop.f32.mrb[0].mxu1 }
 0x278   : > { %v408_v20 = vadd.f32 %v407_v19, %v332_v18  ;;  %v543_v21 = vpop.f32.mrb[1].mxu1 }
 0x27a   : > { %v411_v22 = vadd.f32 3.0, %v408_v20 }
 0x27c   : > { %v412_v23 = vmul.f32 0.16666667, %v411_v22 }
 0x27e   : > { %v413_v24 = vmax.f32 %v412_v23, 0.0 }
 0x280   : > { %v414_v26 = vmin.f32 %v413_v24, 1.0 }
 0x282   : > { %v418_v27 = vrot.slane %v414_v26, %v417_v25 }
 0x284   : > { %420 = vbcast.lane.b32.xlu0 %v418_v27, 256 }
 0x2f6   : > { %v421_v28 = vpop.permute.xlu0 %420 }
 0x2f7   : > { %v422_v29 = vmul.f32 %v421_v28, %v241_v0  ;;  %v423_v30 = vmul.f32 %v421_v28, %v242_v1 }
 0x2f9   : > { %424 = vst [vmem:[%s240_s9] sm:$0xff] %v422_v29  ;;  %425 = vst [vmem:[%s240_s9 + $0x8] sm:$0xff] %v423_v30 }
 0x2fa   : > { %635 = shalt.err (!%p632_p4)
}
 0x2fb   : > { %s636_s13 = scalar_lea.hbm %s857_s15, 256  ;;  %s640_s26 = scalar_lea.hbm %s906_s5, 512 }
 0x2fc   : > { %p637_p5 = scmp.ne.s32.totalorder %s857_s15, %s636_s13  ;;  %p641_p0 = scmp.lt.u32.totalorder %s857_s15, %s906_s5 }
 0x2fd   : > { %p642_p1 = scmp.lt.u32.totalorder %s640_s26, %s636_s13  ;;  %p644_p6 = scmp.lt.u32.totalorder %s636_s13, %s857_s15 }
 0x2fe   : > { %p638_p8 = pnand %p637_p5, %p915_p11 }
 0x2ff   : > { %p643_p3 = por %p642_p1, %p641_p0 }
 0x300   : > { %p639_p9 = pneg %p638_p8 }
 0x301   : > { %p645_p12 = por %p644_p6, %p643_p3 }
 0x303   : > { %p646_p13 = pnand %p645_p12, %p639_p9 }
 0x305   : > { %649 = shalt.err (!%p646_p13)
}
 0x306   : > { %546 = dma.vmem_to_hbm [thread:$0]  (%p915_p11), %s859_s10, 256, %s857_s15, %s427_s12  }
 0x307 PF: > { %s453_s7 = sand.u32 1, %s676_s18   ;;  %p916_p7 = scmp.ne.s32.totalorder %s911_s6, 0 }
 0x308   : > { %p917_p10 = scmp.ge.s32.totalorder %s688_s21, 2  ;;  %s454_s9 = scalar_lea.sflag [#allocation4], %s453_s7 }
 0x30a   : > { %p553_p2 = pnand %p917_p10, %p916_p7 }
 0x30c   : > { %671 = dma.done.wait (!%p553_p2), %s454_s9, 256  }
 0x30d   : > { %673 = vsyncadd (!%p553_p2), %s454_s9, 4294967040  ;;  %p18_p4 = scmp.ge.s32.totalorder %s749_s24, 4   ;;  %s918_s18 = smov %s680_s19 }
 0x30e   : > { %s919_s19 = smov %s684_s20  ;;  %s920_s20 = smov %s761_s27 }
 0x30f   : > { %s921_s21 = smov %s749_s24  ;;  %20 = sbr.rel (!%p18_p4) target bundleno = 5 (0x5), region = 85 }
 0x316   :  { %459 = vsyncpa [#allocation3], 1 }
 0x317   :  { %461 = vsyncpa [#allocation3 + $0x1], 1 }
 0x318   :  { %462 = vsyncpa [#allocation4], 1 }
 0x319   :  { %464 = vsyncpa [#allocation4 + $0x1], 1 }

</bundles_post_ra>
